<compile_context>
chip_gen: v7x
topology: tpu7x:2x2x1
jax: 0.10.0
libtpu: 0.0.40
codegen_flags: <defaults>
</compile_context>

<pallas_src>
import math

import jax
import jax.numpy as jnp
from jax import lax
from jax.experimental import pallas as pl
from jax.experimental.pallas import tpu as pltpu


def _round_up(x, m):
    return ((x + m - 1) // m) * m


def _cdiv(a, b):
    return -(-a // b)


# Conservative per-call VMEM budget for the tiles themselves (fits every
# generation: v5e/v6e have 128 MiB, v7x has 64 MiB per TensorCore).
_VMEM_TILE_BUDGET = 36 * 1024 * 1024


def _vmem_bytes(tb, tc, D):
    """Approximate double-buffered VMEM footprint of all pipelined blocks."""
    b = 0
    b += 2 * tb * D * 2          # x tile (bf16), double-buffered
    b += 2 * D * tc * 2          # W^T tile (bf16), streamed over class tiles
    b += 2 * tb * tc * 4         # mixed-logits output tile (f32)
    b += 2 * tb * tc * 2         # clamped-cos output tile (bf16)
    b += 2 * 8 * tc * 4          # bsum accumulator tile (f32)
    b += 2 * 8 * tc * 4          # inv_wn tile (f32, sublane-padded)
    b += 4 * tb * 128 * 4        # labels + inv_xn tiles (lane-padded)
    return b


def _make_adacos_kernel(tb, tc, B_actual, C_actual, B_pad, C_pad, m):
    cos_m = math.cos(m)
    sin_m = math.sin(m)
    clip_lo = -1.0 + 1e-7
    clip_hi = 1.0 - 1e-7
    need_row_mask = B_pad != B_actual
    need_col_mask = C_pad != C_actual

    def kernel(s_ref, label_ref, x_ref, inv_xn_ref, wt_ref, inv_wn_ref,
               out_ref, clamp_ref, bsum_ref):
        j = pl.program_id(1)     # class-tile index (reduction axis for bsum)

        # bsum block index depends only on the batch tile -> grid-resident
        # across the class axis; zero it on the first class tile.
        @pl.when(j == 0)
        def _():
            bsum_ref[...] = jnp.zeros_like(bsum_ref)

        # bf16 MXU matmul with f32 accumulation; normalization applied as an
        # outer-product scale with the precomputed inverse norms.
        raw = jnp.dot(x_ref[...], wt_ref[...],
                      preferred_element_type=jnp.float32)                # (tb, tc)
        logits = raw * inv_xn_ref[...] * inv_wn_ref[...]

        c = jnp.clip(logits, clip_lo, clip_hi)
        clamp_ref[...] = c.astype(clamp_ref.dtype)

        labels = label_ref[...]                                          # (tb, 1) int32
        cols = lax.broadcasted_iota(jnp.int32, (tb, tc), 1) + j * tc
        one_hot = (cols == labels).astype(jnp.float32)

        # target logit only for the label column:
        #   cos(theta + m) = c*cos(m) - sqrt(1 - c^2)*sin(m), theta in [0, pi]
        c_lbl = jnp.sum(c * one_hot, axis=-1, keepdims=True)             # (tb, 1)
        sin_lbl = jnp.sqrt(jnp.maximum(1.0 - c_lbl * c_lbl, 0.0))
        target_lbl = c_lbl * cos_m - sin_lbl * sin_m                     # (tb, 1)
        out_ref[...] = logits + one_hot * (target_lbl - logits)

        # B_avg numerator: sum over non-target (and non-padded) entries of
        # exp(s * logits).  s is the current adaptive scale (runtime SMEM
        # scalar).  Masking via multiplies (VPU), not selects.
        b_mat = jnp.exp(s_ref[0] * logits) * (1.0 - one_hot)
        if need_row_mask:
            rows = (lax.broadcasted_iota(jnp.int32, (tb, tc), 0)
                    + pl.program_id(0) * tb)
            b_mat = b_mat * (rows < B_actual).astype(jnp.float32)
        if need_col_mask:
            b_mat = b_mat * (cols < C_actual).astype(jnp.float32)

        # vreg-shaped partial accumulate: fold sublane groups on top of each
        # other (no lane splitting, so this is pure elementwise vreg adds).
        bsum_ref[...] += jnp.sum(b_mat.reshape(tb // 8, 8, tc), axis=0)

    return kernel


def adacos_forward(x, labels, weight, *, s=None, m=0.5,
                   theta_zero=math.pi / 4, tb=None, tc=None):
    """Returns (output, s_new) matching AdaCos.forward with ls_eps = 0.

    `s` is the *current* adaptive scale (defaults to the AdaCos init value);
    it is passed to the kernel as a runtime scalar, so updating it between
    training steps does not trigger a recompile.
    """
    B, D = x.shape
    C, D2 = weight.shape
    assert D == D2
    if s is None:
        s = math.log(C - 1) / math.cos(theta_zero)

    # Tile sizes: rows a multiple of 16 (bf16 sublane packing) with >= 2 batch
    # tiles when possible (v7x megacore); class tiles a multiple of 128 lanes,
    # shrunk until the double-buffered footprint fits the VMEM budget.
    if tb is None:
        tb = min(_round_up(max(_cdiv(B, 2), 1), 16), 256)
    if tc is None:
        tc = min(_round_up(C, 128), 1024)
        while tc > 128 and _vmem_bytes(tb, tc, D) > _VMEM_TILE_BUDGET:
            tc = max(128, _round_up(tc // 2, 128))
    assert tb % 8 == 0 and tc % 128 == 0   # tb % 16 == 0 preferred (bf16 packing)

    B_pad = _round_up(B, tb)
    C_pad = _round_up(C, tc)
    nb, nc = B_pad // tb, C_pad // tc

    eps2 = 1e-24   # (1e-12)^2 -> matches F.normalize's eps applied to the norm

    # --- hoisted normalization / dtype prep (done once, outside the grid) ---
    x_f32 = x.astype(jnp.float32)
    inv_xn = lax.rsqrt(jnp.maximum(
        jnp.sum(x_f32 * x_f32, axis=-1, keepdims=True), eps2))          # (B, 1)
    x_bf16 = x_f32.astype(jnp.bfloat16)
    if B_pad != B:
        x_bf16 = jnp.pad(x_bf16, ((0, B_pad - B), (0, 0)))
        inv_xn = jnp.pad(inv_xn, ((0, B_pad - B), (0, 0)))

    w_f32 = weight.astype(jnp.float32)
    inv_wn = lax.rsqrt(jnp.maximum(
        jnp.sum(w_f32 * w_f32, axis=-1, keepdims=True), eps2)).T        # (1, C)
    wt = w_f32.astype(jnp.bfloat16).T                                    # (D, C)
    if C_pad != C:
        wt = jnp.pad(wt, ((0, 0), (0, C_pad - C)))
        inv_wn = jnp.pad(inv_wn, ((0, 0), (0, C_pad - C)))

    lab = labels.astype(jnp.int32)
    if B_pad != B:
        lab = jnp.pad(lab, (0, B_pad - B), constant_values=-1)  # never matches a class
    lab2d = lab.reshape(B_pad, 1)

    s_arr = jnp.asarray(s, dtype=jnp.float32).reshape(1)

    kernel = _make_adacos_kernel(tb, tc, B, C, B_pad, C_pad, m)

    footprint = _vmem_bytes(tb, tc, D)
    vmem_limit = int(min(max(footprint * 5 // 4 + (8 << 20), 32 << 20), 48 << 20))

    out_pad, clamp_pad, bsum_part = pl.pallas_call(
        kernel,
        out_shape=(
            jax.ShapeDtypeStruct((B_pad, C_pad), jnp.float32),   # mixed logits (unscaled)
            jax.ShapeDtypeStruct((B_pad, C_pad), jnp.bfloat16),  # clamped cos(theta)
            jax.ShapeDtypeStruct((nb * 8, tc), jnp.float32),     # per-batch-tile bsum partials
        ),
        grid_spec=pltpu.PrefetchScalarGridSpec(
            num_scalar_prefetch=0,
            grid=(nb, nc),
            in_specs=[
                pl.BlockSpec(memory_space=pltpu.MemorySpace.SMEM),  # s (runtime scalar)
                pl.BlockSpec((tb, 1), lambda i, j: (i, 0)),         # labels
                pl.BlockSpec((tb, D), lambda i, j: (i, 0)),         # x   (bf16)
                pl.BlockSpec((tb, 1), lambda i, j: (i, 0)),         # inv row norms (f32)
                pl.BlockSpec((D, tc), lambda i, j: (0, j)),         # W^T (bf16), streamed
                pl.BlockSpec((1, tc), lambda i, j: (0, j)),         # inv col norms (f32)
            ],
            out_specs=(
                pl.BlockSpec((tb, tc), lambda i, j: (i, j)),
                pl.BlockSpec((tb, tc), lambda i, j: (i, j)),
                pl.BlockSpec((8, tc), lambda i, j: (i, 0)),         # resident across j
            ),
        ),
        compiler_params=pltpu.CompilerParams(
            dimension_semantics=("parallel", "arbitrary"),
            vmem_limit_bytes=vmem_limit,
        ),
    )(s_arr, lab2d, x_bf16, inv_xn, wt, inv_wn)

    out_unscaled = out_pad[:B, :C]
    clamped = jnp.clip(clamp_pad[:B, :C].astype(jnp.float32), -1.0, 1.0)

    # TODO(synk): global median has no clean Pallas equivalent; computed in JAX.
    theta = jnp.arccos(clamped)
    n = theta.size
    theta_med = jnp.sort(theta.reshape(-1))[(n - 1) // 2]   # torch lower median

    B_avg = jnp.sum(bsum_part) / B
    s_new = jnp.log(B_avg) / jnp.cos(jnp.minimum(theta_zero, theta_med))
    output = out_unscaled * s_new          # fused by XLA with the slice above
    return output, s_new


def _reference(x, labels, weight, *, m=0.5, theta_zero=math.pi / 4):
    """Pure-JAX (full f32) transcription of the PyTorch forward, for verification."""
    B, _ = x.shape
    C, _ = weight.shape
    s = math.log(C - 1) / math.cos(theta_zero)
    xn = x / jnp.maximum(jnp.linalg.norm(x, axis=-1, keepdims=True), 1e-12)
    wn = weight / jnp.maximum(jnp.linalg.norm(weight, axis=-1, keepdims=True), 1e-12)
    logits = xn @ wn.T
    theta = jnp.arccos(jnp.clip(logits, -1.0 + 1e-7, 1.0 - 1e-7))
    target_logits = jnp.cos(theta + m)
    one_hot = jax.nn.one_hot(labels, C, dtype=jnp.float32)
    output = logits * (1.0 - one_hot) + target_logits * one_hot
    b_avg = jnp.sum(jnp.where(one_hot < 1, jnp.exp(s * logits), 0.0)) / B
    theta_med = jnp.sort(theta.reshape(-1))[(theta.size - 1) // 2]
    s_new = jnp.log(b_avg) / jnp.cos(jnp.minimum(theta_zero, theta_med))
    return output * s_new, s_new


if __name__ == "__main__":
    base_key = jax.random.PRNGKey(0)

    def run_case(B, D, C, tb=None, tc=None, case=0):
        kx, kw, kl = jax.random.split(jax.random.fold_in(base_key, case), 3)
        x = jax.random.normal(kx, (B, D), dtype=jnp.float32)
        # xavier_uniform_ for weight (C, D): U(-a, a), a = sqrt(6/(fan_in+fan_out))
        bound = math.sqrt(6.0 / (D + C))
        weight = jax.random.uniform(kw, (C, D), dtype=jnp.float32,
                                    minval=-bound, maxval=bound)
        labels = jax.random.randint(kl, (B,), 0, C, dtype=jnp.int32)

        out, s_new = adacos_forward(x, labels, weight, tb=tb, tc=tc)
        out = jax.block_until_ready(out)
        s_new = jax.block_until_ready(s_new)

        out_ref, s_ref = _reference(x, labels, weight)
        assert out.shape == (B, C)
        # bf16 MXU operands -> compare against the f32 reference with a
        # relaxed tolerance.
        assert jnp.allclose(out, out_ref, atol=3e-2, rtol=3e-2), (
            "case", case, "max abs err", float(jnp.max(jnp.abs(out - out_ref))))
        assert jnp.allclose(s_new, s_ref, atol=3e-2, rtol=3e-2), (
            case, float(s_new), float(s_ref))

    # Single-tile grid (1,1): exercises row padding (B=8 -> 16) and col padding
    # (C=16 -> 128) masks.
    run_case(8, 32, 16, case=0)
    # 2x2 grid: multi-tile batch axis ("parallel"), class-axis accumulation of
    # the resident bsum block, and the col mask on the last class tile.
    run_case(32, 64, 200, tb=16, tc=128, case=1)
    # Default tiling path (tb=16, tc=384): row mask + two batch tiles.
    run_case(20, 48, 300, case=2)

    print("KERNEL_OK")
</pallas_src>

<mosaic_0001>
module attributes {stable_mosaic.version = 11 : i64} {
  func.func @kernel(%arg0: i32, %arg1: i32, %arg2: memref<1xf32, #tpu.memory_space<smem>>, %arg3: memref<16x1xi32, #tpu.memory_space<vmem>>, %arg4: memref<16x32xbf16, #tpu.memory_space<vmem>>, %arg5: memref<16x1xf32, #tpu.memory_space<vmem>>, %arg6: memref<32x128xbf16, #tpu.memory_space<vmem>>, %arg7: memref<1x128xf32, #tpu.memory_space<vmem>>, %arg8: memref<16x128xf32, #tpu.memory_space<vmem>>, %arg9: memref<16x128xbf16, #tpu.memory_space<vmem>>, %arg10: memref<8x128xf32, #tpu.memory_space<vmem>>) attributes {dimension_semantics = [#tpu.dimension_semantics<parallel>, #tpu.dimension_semantics<arbitrary>], iteration_bounds = array<i64: 1, 1>, scalar_prefetch = 0 : i64, scratch_operands = 0 : i64, tpu.core_type = #tpu.core_type<tc>, window_params = [{transform_indices = @transform_0, window_bounds = array<i64: 1>}, {transform_indices = @transform_1, window_bounds = array<i64: 16, 1>}, {transform_indices = @transform_2, window_bounds = array<i64: 16, 32>}, {transform_indices = @transform_3, window_bounds = array<i64: 16, 1>}, {transform_indices = @transform_4, window_bounds = array<i64: 32, 128>}, {transform_indices = @transform_5, window_bounds = array<i64: 1, 128>}, {transform_indices = @transform_6, window_bounds = array<i64: 16, 128>}, {transform_indices = @transform_7, window_bounds = array<i64: 16, 128>}, {transform_indices = @transform_8, window_bounds = array<i64: 8, 128>}]} {
    %c0_i32 = arith.constant 0 : i32
    %0 = arith.cmpi eq, %arg1, %c0_i32 : i32
    %1 = arith.extui %0 : i1 to i32
    %c0_i32_0 = arith.constant 0 : i32
    %2 = arith.cmpi ne, %1, %c0_i32_0 : i32
    scf.if %2 {
      %cst_29 = arith.constant 0.000000e+00 : f32
      %72 = vector.broadcast %cst_29 : f32 to vector<8x128xf32>
      %c0_30 = arith.constant 0 : index
      %c0_31 = arith.constant 0 : index
      %73 = vector.load %arg10[%c0_30, %c0_31] : memref<8x128xf32, #tpu.memory_space<vmem>>, vector<8x128xf32>
      tpu.vector_store %arg10[%c0_30, %c0_31], %72 {strides = array<i32>} : memref<8x128xf32, #tpu.memory_space<vmem>>, vector<8x128xf32>,
    } else {
    }
    %c0 = arith.constant 0 : index
    %c0_1 = arith.constant 0 : index
    %3 = vector.load %arg4[%c0, %c0_1] : memref<16x32xbf16, #tpu.memory_space<vmem>>, vector<16x32xbf16>
    %c0_2 = arith.constant 0 : index
    %c0_3 = arith.constant 0 : index
    %4 = vector.load %arg6[%c0_2, %c0_3] : memref<32x128xbf16, #tpu.memory_space<vmem>>, vector<32x128xbf16>
    %cst = arith.constant dense<0.000000e+00> : vector<16x128xf32>
    %5 = tpu.matmul %3, %4, %cst {dimension_numbers = #tpu.dot_dimension_numbers<[1], [0], [0], [1], [0, 0, 1, 1], [], []>} : vector<16x32xbf16>, vector<32x128xbf16>, vector<16x128xf32> -> vector<16x128xf32>
    %c0_4 = arith.constant 0 : index
    %c0_5 = arith.constant 0 : index
    %6 = vector.load %arg5[%c0_4, %c0_5] : memref<16x1xf32, #tpu.memory_space<vmem>>, vector<16x1xf32>
    %7 = vector.broadcast %6 : vector<16x1xf32> to vector<16x128xf32>
    %8 = arith.mulf %5, %7 : vector<16x128xf32>
    %c0_6 = arith.constant 0 : index
    %c0_7 = arith.constant 0 : index
    %9 = vector.load %arg7[%c0_6, %c0_7] : memref<1x128xf32, #tpu.memory_space<vmem>>, vector<1x128xf32>
    %10 = vector.broadcast %9 : vector<1x128xf32> to vector<16x128xf32>
    %11 = arith.mulf %8, %10 : vector<16x128xf32>
    %cst_8 = arith.constant -0.99999988 : f32
    %cst_9 = arith.constant 0.99999988 : f32
    %12 = vector.broadcast %cst_8 : f32 to vector<16x128xf32>
    %13 = arith.maximumf %12, %11 : vector<16x128xf32>
    %14 = vector.broadcast %cst_9 : f32 to vector<16x128xf32>
    %15 = arith.minimumf %14, %13 : vector<16x128xf32>
    %16 = arith.truncf %15 : vector<16x128xf32> to vector<16x128xbf16>
    %c0_10 = arith.constant 0 : index
    %c0_11 = arith.constant 0 : index
    %17 = vector.load %arg9[%c0_10, %c0_11] : memref<16x128xbf16, #tpu.memory_space<vmem>>, vector<16x128xbf16>
    tpu.vector_store %arg9[%c0_10, %c0_11], %16 {strides = array<i32>} : memref<16x128xbf16, #tpu.memory_space<vmem>>, vector<16x128xbf16>,
    %c0_12 = arith.constant 0 : index
    %c0_13 = arith.constant 0 : index
    %18 = vector.load %arg3[%c0_12, %c0_13] : memref<16x1xi32, #tpu.memory_space<vmem>>, vector<16x1xi32>
    %19 = tpu.iota {dimensions = array<i32: 1>} : vector<16x128xi32>
    %c128_i32 = arith.constant 128 : i32
    %20 = arith.muli %arg1, %c128_i32 : i32
    %21 = vector.broadcast %20 : i32 to vector<16x128xi32>
    %22 = arith.addi %19, %21 : vector<16x128xi32>
    %23 = vector.broadcast %18 : vector<16x1xi32> to vector<16x128xi32>
    %24 = arith.cmpi eq, %22, %23 : vector<16x128xi32>
    %25 = arith.extui %24 : vector<16x128xi1> to vector<16x128xi32>
    %26 = arith.sitofp %25 : vector<16x128xi32> to vector<16x128xf32>
    %27 = arith.mulf %15, %26 : vector<16x128xf32>
    %cst_14 = arith.constant dense<0.000000e+00> : vector<16xf32>
    %28 = vector.multi_reduction <add>, %27, %cst_14 [1] : vector<16x128xf32> to vector<16xf32>
    %29 = vector.shape_cast %28 : vector<16xf32> to vector<16x1xf32>
    %30 = arith.mulf %29, %29 : vector<16x1xf32>
    %cst_15 = arith.constant 1.000000e+00 : f32
    %31 = vector.broadcast %cst_15 : f32 to vector<16x1xf32>
    %32 = arith.subf %31, %30 : vector<16x1xf32>
    %cst_16 = arith.constant 0.000000e+00 : f32
    %33 = vector.broadcast %cst_16 : f32 to vector<16x1xf32>
    %34 = arith.maximumf %32, %33 : vector<16x1xf32>
    %35 = math.sqrt %34 : vector<16x1xf32>
    %cst_17 = arith.constant 0.87758255 : f32
    %36 = vector.broadcast %cst_17 : f32 to vector<16x1xf32>
    %37 = arith.mulf %29, %36 : vector<16x1xf32>
    %cst_18 = arith.constant 0.47942555 : f32
    %38 = vector.broadcast %cst_18 : f32 to vector<16x1xf32>
    %39 = arith.mulf %35, %38 : vector<16x1xf32>
    %40 = arith.subf %37, %39 : vector<16x1xf32>
    %41 = vector.broadcast %40 : vector<16x1xf32> to vector<16x128xf32>
    %42 = arith.subf %41, %11 : vector<16x128xf32>
    %43 = arith.mulf %26, %42 : vector<16x128xf32>
    %44 = arith.addf %11, %43 : vector<16x128xf32>
    %c0_19 = arith.constant 0 : index
    %c0_20 = arith.constant 0 : index
    %45 = vector.load %arg8[%c0_19, %c0_20] : memref<16x128xf32, #tpu.memory_space<vmem>>, vector<16x128xf32>
    tpu.vector_store %arg8[%c0_19, %c0_20], %44 {strides = array<i32>} : memref<16x128xf32, #tpu.memory_space<vmem>>, vector<16x128xf32>,
    %c0_21 = arith.constant 0 : index
    %46 = memref.load %arg2[%c0_21] : memref<1xf32, #tpu.memory_space<smem>>
    %47 = vector.broadcast %46 : f32 to vector<16x128xf32>
    %48 = arith.mulf %47, %11 : vector<16x128xf32>
    %49 = math.exp %48 : vector<16x128xf32>
    %cst_22 = arith.constant 1.000000e+00 : f32
    %50 = vector.broadcast %cst_22 : f32 to vector<16x128xf32>
    %51 = arith.subf %50, %26 : vector<16x128xf32>
    %52 = arith.mulf %49, %51 : vector<16x128xf32>
    %53 = tpu.iota {dimensions = array<i32: 0>} : vector<16x128xi32>
    %c16_i32 = arith.constant 16 : i32
    %54 = arith.muli %arg0, %c16_i32 : i32
    %55 = vector.broadcast %54 : i32 to vector<16x128xi32>
    %56 = arith.addi %53, %55 : vector<16x128xi32>
    %c8_i32 = arith.constant 8 : i32
    %57 = vector.broadcast %c8_i32 : i32 to vector<16x128xi32>
    %58 = arith.cmpi slt, %56, %57 : vector<16x128xi32>
    %59 = arith.extui %58 : vector<16x128xi1> to vector<16x128xi32>
    %60 = arith.sitofp %59 : vector<16x128xi32> to vector<16x128xf32>
    %61 = arith.mulf %52, %60 : vector<16x128xf32>
    %c16_i32_23 = arith.constant 16 : i32
    %62 = vector.broadcast %c16_i32_23 : i32 to vector<16x128xi32>
    %63 = arith.cmpi slt, %22, %62 : vector<16x128xi32>
    %64 = arith.extui %63 : vector<16x128xi1> to vector<16x128xi32>
    %65 = arith.sitofp %64 : vector<16x128xi32> to vector<16x128xf32>
    %66 = arith.mulf %61, %65 : vector<16x128xf32>
    %c0_24 = arith.constant 0 : index
    %c0_25 = arith.constant 0 : index
    %67 = vector.load %arg10[%c0_24, %c0_25] : memref<8x128xf32, #tpu.memory_space<vmem>>, vector<8x128xf32>
    %68 = vector.shape_cast %66 : vector<16x128xf32> to vector<2x8x128xf32>
    %cst_26 = arith.constant dense<0.000000e+00> : vector<8x128xf32>
    %69 = vector.multi_reduction <add>, %68, %cst_26 [0] : vector<2x8x128xf32> to vector<8x128xf32>
    %70 = arith.addf %67, %69 : vector<8x128xf32>
    %c0_27 = arith.constant 0 : index
    %c0_28 = arith.constant 0 : index
    %71 = vector.load %arg10[%c0_27, %c0_28] : memref<8x128xf32, #tpu.memory_space<vmem>>, vector<8x128xf32>
    tpu.vector_store %arg10[%c0_27, %c0_28], %70 {strides = array<i32>} : memref<8x128xf32, #tpu.memory_space<vmem>>, vector<8x128xf32>,
    return
  }
  func.func @transform_0(%arg0: i32, %arg1: i32) -> i32 {
    %c0_i32 = arith.constant 0 : i32
    %c0_i32_0 = arith.constant 0 : i32
    return %c0_i32 : i32
  }
  func.func @transform_1(%arg0: i32, %arg1: i32) -> (i32, i32) {
    %c0_i32 = arith.constant 0 : i32
    %c0_i32_0 = arith.constant 0 : i32
    return %arg0, %c0_i32 : i32, i32
  }
  func.func @transform_2(%arg0: i32, %arg1: i32) -> (i32, i32) {
    %c0_i32 = arith.constant 0 : i32
    %c0_i32_0 = arith.constant 0 : i32
    return %arg0, %c0_i32 : i32, i32
  }
  func.func @transform_3(%arg0: i32, %arg1: i32) -> (i32, i32) {
    %c0_i32 = arith.constant 0 : i32
    %c0_i32_0 = arith.constant 0 : i32
    return %arg0, %c0_i32 : i32, i32
  }
  func.func @transform_4(%arg0: i32, %arg1: i32) -> (i32, i32) {
    %c0_i32 = arith.constant 0 : i32
    %c0_i32_0 = arith.constant 0 : i32
    return %c0_i32, %arg1 : i32, i32
  }
  func.func @transform_5(%arg0: i32, %arg1: i32) -> (i32, i32) {
    %c0_i32 = arith.constant 0 : i32
    %c0_i32_0 = arith.constant 0 : i32
    return %c0_i32, %arg1 : i32, i32
  }
  func.func @transform_6(%arg0: i32, %arg1: i32) -> (i32, i32) {
    %c0_i32 = arith.constant 0 : i32
    return %arg0, %arg1 : i32, i32
  }
  func.func @transform_7(%arg0: i32, %arg1: i32) -> (i32, i32) {
    %c0_i32 = arith.constant 0 : i32
    return %arg0, %arg1 : i32, i32
  }
  func.func @transform_8(%arg0: i32, %arg1: i32) -> (i32, i32) {
    %c0_i32 = arith.constant 0 : i32
    %c0_i32_0 = arith.constant 0 : i32
    return %arg0, %c0_i32 : i32, i32
  }
}

</mosaic_0001>

<bundles_post_ra>
// kernel: tpu_custom_call.1
= control target key start
LH: loop header
LB: loop body
LE: loop exit
PB: predicated region body
PF: predicated region fallthrough
CT: control target
= control target key end

     0   :  { %15 = vsyncpa [#allocation4], 0  ;;  %v403_v1 = vmov 0.0   ;;  %vm404_vm0 = vmmov 0   ;;  %v405_v5 = vmov 0   ;;  %s549_s0 = inlined_call_operand.<no memory space> [shape: f32[1], index: 0, kind: input, shape index: {}]   ;;  %s550_s1 = inlined_call_operand.vmem [shape: s32[16,1], index: 1, kind: input, shape index: {}]   ;;  %s551_s2 = inlined_call_operand.vmem [shape: bf16[16,32], index: 2, kind: input, shape index: {}]   ;;  %s552_s3 = inlined_call_operand.vmem [shape: f32[16,1], index: 3, kind: input, shape index: {}]   ;;  %s553_s4 = inlined_call_operand.vmem [shape: bf16[32,128], index: 4, kind: input, shape index: {}]   ;;  %s554_s5 = inlined_call_operand.vmem [shape: f32[1,128], index: 5, kind: input, shape index: {}]   ;;  %s555_s6 = inlined_call_operand.hbm [shape: f32[16,128], index: 6, kind: output, shape index: {0}]   ;;  %s556_s7 = inlined_call_operand.hbm [shape: bf16[16,128], index: 7, kind: output, shape index: {1}]   ;;  %s557_s8 = inlined_call_operand.hbm [shape: f32[8,128], index: 8, kind: output, shape index: {2}]  }
   0x1   :  { %v322_v0 = vld [vmem:[%s553_s4] sm:$0xff]   ;;  %302 = vmatprep.subr.bf16.mxu0 %v403_v1  ;;  %v323_v2 = vld [vmem:[%s553_s4 + $0x8] sm:$0xff]   ;;  %306 = vmatprep.mubr.msk.bf16.mxu0 %vm404_vm0, %v403_v1 }
   0x2   :  { %303 = vmatpush3.bf16.msra.mxu0 %v322_v0  ;;  %v103_v3 = vld [vmem:[%s552_s3] sm:$0xff]  ;;  %320 = vset.pattern.permute.xlu0 %v405_v5 }
   0x3   :  { %304 = vmatprep.subr.bf16.mxu0 %v403_v1  ;;  %v140_v4 = vld [vmem:[%s550_s1] sm:$0xff]  ;;  %321 = vset.pattern.permute.xlu1 %v405_v5 }
   0x4   :  { %16 = vsyncpa [#allocation6], 0  ;;  %v324_v6 = vld [vmem:[%s551_s2] sm:$0xff]   ;;  %107 = vperm.xlu0 %320, %v103_v3   ;;  %148 = vperm.xlu1 %321, %v140_v4   ;;  %vm58_vm1 = vcmask 261120   ;;  %v104_v7 = vld [vmem:[%s552_s3 + $0x8] sm:$0xff]  ;;  %v142_v10 = vlaneseq  ;;  %v200_v18 = vstv %s549_s0  ;;  %s406_s0 = smov [#allocation5]  }
   0x5   :  { %v141_v8 = vld [vmem:[%s550_s1 + $0x8] sm:$0xff]  ;;  %v284_v14 = vld [vmem:[%s554_s5] ss:$0 sm:$0xff]  ;;  %s252_s1 = sshll.u32 %s406_s0, 4  ;;  %s253_s1 = int_to_ptr.vmem [resolvable:$true] %s252_s1 }
   0x6   :  { %305 = vmatpush3.bf16.msra.mxu0 %v323_v2  ;;  %v143_v12 = vand.u32 127, %v142_v10  ;;  %s333_s5 = scalar_lea.vmem %s253_s1, 128  ;;  %p338_p1 = scmp.lt.s32.totalorder %s253_s1, %s253_s1 }
   0x7   :  { %p334_p0 = scmp.ne.s32.totalorder %s253_s1, %s333_s5  ;;  %p339_p2 = scmp.lt.s32.totalorder %s333_s5, %s333_s5 }
   0x8   :  { %112 = vperm.xlu0 %320, %v104_v7   ;;  %151 = vperm.xlu1 %321, %v141_v8   ;;  %vm226_vm4 = vcmp.lt.s32.totalorder %v143_v12, 16 }
   0x9   :  { %307 = vmatmul.mubr.msk.bf16.vlgmr.msra.gmra.mrb[0].mxu0 %vm58_vm1, %v324_v6  ;;  %v291_v42 = vsel %vm226_vm4, 1.0, %v403_v1  ;;  %p340_p3 = por %p339_p2, %p338_p1 }
   0xb   :  { %p341_p4 = pnand %p340_p3, %p334_p0 }
  0x83   :  { %v108_v9 = vpop.permute.xlu0 %107  ;;  %v149_v11 = vpop.permute.xlu1 %148 }
  0x84   :  { %vm153_vm2 = vcmp.eq.s32.totalorder %v143_v12, %v149_v11 }
  0x85   :  { %v495_v27 = vsel %vm153_vm2, 1.0, %v403_v1 }
  0x86   :  { %v207_v37 = vsub.f32 1.0, %v495_v27 }
  0x87   :  { %v113_v15 = vpop.permute.xlu0 %112  ;;  %v152_v19 = vpop.permute.xlu1 %151 }
  0x88   :  { %vm154_vm3 = vcmp.eq.s32.totalorder %v143_v12, %v152_v19 }
  0x89   :  { %v501_v32 = vsel %vm154_vm3, 1.0, %v403_v1 }
  0x8a   :  { %v208_v38 = vsub.f32 1.0, %v501_v32 }
  0xdc   :  { %v96_v13 = vpop.f32.mrb[0].mxu0 }
  0xdd   :  { %v115_v16 = vmul.f32 %v108_v9, %v96_v13  ;;  %v308_v17 = vpop.f32.mrb[1].mxu0 }
  0xde   :  { %v99_v20 = vpop.f32.mrb[2].mxu0 }
  0xdf   :  { %v488_v21 = vmul.f32 %v284_v14, %v115_v16  ;;  %v116_v22 = vmul.f32 %v113_v15, %v99_v20  ;;  %v309_v23 = vpop.f32.mrb[3].mxu0 }
  0xe1   :  { %v201_v24 = vmul.f32 %v200_v18, %v488_v21  ;;  %v491_v25 = vmul.f32 %v284_v14, %v116_v22  ;;  %v285_v26 = vclamps-f32 %v488_v21, 0.9999999 }
  0xe3   :  { %v203_v28 = vmul.f32 1.442695, %v201_v24  ;;  %v202_v29 = vmul.f32 %v200_v18, %v491_v25  ;;  %v159_v30 = vmul.f32 %v495_v27, %v285_v26  ;;  %v286_v31 = vclamps-f32 %v491_v25, 0.9999999 }
  0xe5   :  { %325 = vpow2.f32 %v203_v28  ;;  %v205_v33 = vmul.f32 1.442695, %v202_v29  ;;  %161 = vadd.xlane.f32.xlu0 %v159_v30  ;;  %v160_v34 = vmul.f32 %v501_v32, %v286_v31  ;;  %v297_v35 = vpack.c.bf16 %v286_v31, %v285_v26 }
  0xe7   :  { %327 = vpow2.f32 %v205_v33  ;;  %163 = vadd.xlane.f32.xlu1 %v160_v34  ;;  %298 = vst [vmem:[#allocation5] sm:$0xff] %v297_v35  }
  0xef   :  { %v326_v36 = vpop.eup %325 }
  0xf0   :  { %v209_v40 = vmul.f32 %v326_v36, %v207_v37 }
  0xf1   :  { %v328_v39 = vpop.eup %327 }
  0xf2   :  { %v210_v41 = vmul.f32 %v328_v39, %v208_v38  ;;  %v229_v44 = vmul.f32 %v291_v42, %v209_v40 }
  0xf4   :  { %v225_v43 = vmul.f32 0.0, %v210_v41 }
  0xf6   :  { %v230_v45 = vmul.f32 %v291_v42, %v225_v43 }
  0xf8   :  { %v232_v46 = vadd.f32 %v230_v45, %v229_v44 }
  0xfa   :  { %234 = vst [vmem:[#allocation7] sm:$0xff] %v232_v46 }
  0xfb   :  { %344 = shalt.err (!%p341_p4)
}
  0xfc   :  { %s345_s22 = scalar_lea.hbm %s556_s7, 128 }
  0xfd   :  { %p346_p5 = scmp.ne.s32.totalorder %s556_s7, %s345_s22  ;;  %p349_p6 = scmp.lt.u32.totalorder %s345_s22, %s556_s7 }
  0xff   :  { %p351_p7 = pnand %p349_p6, %p346_p5 }
 0x101   :  { %354 = shalt.err (!%p351_p7)
}
 0x102   :  { %s407_s27 = smov 64   ;;  %s408_s28 = smov 4  }
 0x103   :  { %258 = dma.vmem_to_hbm [thread:$0]  %s253_s1, 128, %s556_s7, [#allocation6], %s407_s27, %s407_s27, %s408_s28  }
 0x104   :  { %s409_s9 = smov [#allocation7]  }
 0x105   :  { %s265_s10 = sshll.u32 %s409_s9, 4  ;;  %s266_s10 = int_to_ptr.vmem [resolvable:$true] %s265_s10 }
 0x106   :  { %s355_s11 = scalar_lea.vmem %s266_s10, 128  ;;  %p360_p9 = scmp.lt.s32.totalorder %s266_s10, %s266_s10 }
 0x107   :  { %p356_p8 = scmp.ne.s32.totalorder %s266_s10, %s355_s11  ;;  %p361_p10 = scmp.lt.s32.totalorder %s355_s11, %s355_s11 }
 0x109   :  { %p362_p11 = por %p361_p10, %p360_p9 }
 0x10b   :  { %p363_p12 = pnand %p362_p11, %p356_p8 }
 0x10d   :  { %366 = shalt.err (!%p363_p12)
}
 0x10e   :  { %s367_s14 = scalar_lea.hbm %s557_s8, 128 }
 0x10f   :  { %p368_p13 = scmp.ne.s32.totalorder %s557_s8, %s367_s14  ;;  %p371_p0 = scmp.lt.u32.totalorder %s367_s14, %s557_s8 }
 0x111   :  { %p373_p1 = pnand %p371_p0, %p368_p13 }
 0x113   :  { %376 = shalt.err (!%p373_p1)
}
 0x114   :  { %268 = dma.vmem_to_hbm [thread:$0]  %s266_s10, 128, %s557_s8, [#allocation6]  }
 0x115   :  { %s410_s8 = smov [#allocation3]  }
 0x116   :  { %s240_s18 = sshll.u32 %s410_s8, 4  ;;  %s241_s18 = int_to_ptr.vmem [resolvable:$true] %s240_s18 }
 0x117   :  { %s377_s3 = scalar_lea.vmem %s241_s18, 256  ;;  %p382_p3 = scmp.lt.s32.totalorder %s241_s18, %s241_s18 }
 0x118   :  { %p378_p2 = scmp.ne.s32.totalorder %s241_s18, %s377_s3  ;;  %p383_p4 = scmp.lt.s32.totalorder %s377_s3, %s377_s3 }
 0x11a   :  { %p384_p5 = por %p383_p4, %p382_p3 }
 0x11c   :  { %p385_p6 = pnand %p384_p5, %p378_p2 }
 0x172   :  { %v162_v47 = vpop.xlane.xlu0 %161 }
 0x173   :  { %v165_v48 = vmul.f32 %v162_v47, %v162_v47  ;;  %v185_v62 = vmul.f32 0.87758255, %v162_v47 }
 0x174   :  { %v164_v49 = vpop.xlane.xlu1 %163 }
 0x175   :  { %v167_v50 = vsub.f32 1.0, %v165_v48  ;;  %v166_v51 = vmul.f32 %v164_v49, %v164_v49  ;;  %v186_v4 = vmul.f32 0.87758255, %v164_v49 }
 0x177   :  { %v169_v52 = vmax.f32 %v167_v50, 0.0  ;;  %v168_v53 = vsub.f32 1.0, %v166_v51 }
 0x179   :  { %329 = vrsqrt.f32 %v169_v52  ;;  %v170_v54 = vmax.f32 %v168_v53, 0.0  ;;  %vm173_vm5 = vcmp.eq.f32.partialorder %v169_v52, inf  ;;  %v176_v57 = vand.u32 2147483648, %v169_v52 }
 0x17a   :  { %vm175_vm6 = vcmp.eq.f32.partialorder %v169_v52, 0.0 }
 0x17b   :  { %331 = vrsqrt.f32 %v170_v54  ;;  %vm180_vm7 = vcmp.eq.f32.partialorder %v170_v54, inf  ;;  %v183_v0 = vand.u32 2147483648, %v170_v54  ;;  %vm182_vm8 = vcmp.eq.f32.partialorder %v170_v54, 0.0 }
 0x183   :  { %v330_v55 = vpop.eup %329 }
 0x184   :  { %v172_v56 = vmul.f32 %v330_v55, %v169_v52 }
 0x185   :  { %v332_v58 = vpop.eup %331 }
 0x186   :  { %v174_v59 = vsel %vm173_vm5, %v169_v52, %v172_v56  ;;  %v179_v61 = vmul.f32 %v332_v58, %v170_v54 }
 0x187   :  { %v177_v60 = vsel %vm175_vm6, %v176_v57, %v174_v59 }
 0x188   :  { %v187_v63 = vmul.f32 0.47942555, %v177_v60  ;;  %v181_v1 = vsel %vm180_vm7, %v170_v54, %v179_v61 }
 0x189   :  { %v184_v3 = vsel %vm182_vm8, %v183_v0, %v181_v1 }
 0x18a   :  { %v189_v2 = vsub.f32 %v185_v62, %v187_v63  ;;  %v188_v5 = vmul.f32 0.47942555, %v184_v3 }
 0x18c   :  { %v191_v6 = vsub.f32 %v189_v2, %v488_v21  ;;  %v190_v7 = vsub.f32 %v186_v4, %v188_v5 }
 0x18e   :  { %v193_v8 = vmul.f32 %v495_v27, %v191_v6  ;;  %v192_v9 = vsub.f32 %v190_v7, %v491_v25 }
 0x190   :  { %v195_v10 = vadd.f32 %v193_v8, %v488_v21  ;;  %v194_v11 = vmul.f32 %v501_v32, %v192_v9 }
 0x192   :  { %197 = vst [vmem:[#allocation3] sm:$0xff] %v195_v10  ;;  %v196_v12 = vadd.f32 %v194_v11, %v491_v25 }
 0x194   :  { %198 = vst [vmem:[#allocation3 + $0x8] sm:$0xff] %v196_v12 }
 0x195   :  { %388 = shalt.err (!%p385_p6)
}
 0x196   :  { %s389_s1 = scalar_lea.hbm %s555_s6, 256 }
 0x197   :  { %p390_p7 = scmp.ne.s32.totalorder %s555_s6, %s389_s1  ;;  %p393_p8 = scmp.lt.u32.totalorder %s389_s1, %s555_s6 }
 0x199   :  { %p395_p9 = pnand %p393_p8, %p390_p7 }
 0x19b   :  { %398 = shalt.err (!%p395_p9)
}
 0x19c   :  { %s411_s23 = smov 128   ;;  %s412_s24 = smov 8  }
 0x19d   :  { %246 = dma.vmem_to_hbm [thread:$0]  %s241_s18, 256, %s555_s6, [#allocation4], %s411_s23, %s411_s23, %s412_s24  }
 0x19e   :  { %399 = dma.done.wait [#allocation4], 256  }
 0x19f   :  { %400 = vsyncadd [#allocation4], 4294967040 }
 0x1a0   :  { %401 = dma.done.wait [#allocation6], 256  }
 0x1a1   :  { %402 = vsyncadd [#allocation6], 4294967040 }
 0x1a2   :  { %278 = vsyncpa [#allocation4], 1 }
 0x1a3   :  { %279 = vsyncpa [#allocation6], 1 }

</bundles_post_ra>
